<compile_context>
chip_gen: v7x
topology: tpu7x:2x2x1
jax: 0.10.0
libtpu: 0.0.40
codegen_flags: <defaults>
</compile_context>

<pallas_src>
import jax
import jax.numpy as jnp
from jax.experimental import pallas as pl
from jax.experimental.pallas import tpu as pltpu

OUT_LANES = 128              # lane-dense output width; real result is column 0
WEIGHT_DTYPE = jnp.float32   # jnp.bfloat16 on v6e/v7x for ~2x less weight DMA
                             # (then loosen the 1e-4 allclose check)


def fcnet_kernel(x_ref, vec_ref, w2_ref, w3_ref, w4_ref, o_ref):
    # x_ref:   (N_pad, 1)    f32
    # vec_ref: (8, 256)      f32  rows: w1, b1, b2, b3, b4, w5_row, b5, unused
    # w2_ref:  (80, 256)     real (80, 160)
    # w3_ref:  (160, 128)    real (160, 80)
    # w4_ref:  (80, 128)     real (80, 40)
    # o_ref:   (N_pad, 128)  f32  (lane-dense, value replicated across lanes)
    x = x_ref[...]                       # (N_pad, 1)
    vec = vec_ref[...]                   # (8, 256)
    w1r = vec[0:1, :80]
    b1r = vec[1:2, :80]
    b2r = vec[2:3, :]                    # (1, 256), real 160
    b3r = vec[3:4, :128]                 # real 80
    b4r = vec[4:5, :128]                 # real 40
    w5r = vec[5:6, :128]                 # real 40
    b5r = vec[6:7, :OUT_LANES]           # constant, replicated across lanes

    # fc1: degenerate K=1 matmul -> VPU broadcast multiply at the real width.
    # Stable sigmoid via EUP tanh: sigmoid(z) = 0.5*tanh(z/2) + 0.5.
    z1 = x * w1r + b1r                                   # (N_pad, 80)
    h1 = 0.5 * jnp.tanh(0.5 * z1) + 0.5

    dt = w2_ref.dtype  # f32 by default; bf16 if WEIGHT_DTYPE flipped
    # NOTE: default TPU matmul precision is used (matches the JAX reference);
    # use precision=HIGHEST here and in the reference for strict f32 parity.

    # fc2..fc4: MXU matmuls with minimal K (80 / 160 / 80) and 128/256 N lanes.
    h2 = jnp.maximum(
        jnp.dot(h1.astype(dt), w2_ref[...],
                preferred_element_type=jnp.float32) + b2r, 0.0)      # (N, 256)
    h3 = jnp.maximum(
        jnp.dot(h2[:, :160].astype(dt), w3_ref[...],
                preferred_element_type=jnp.float32) + b3r, 0.0)      # (N, 128)
    h4 = jnp.maximum(
        jnp.dot(h3[:, :80].astype(dt), w4_ref[...],
                preferred_element_type=jnp.float32) + b4r, 0.0)      # (N, 128)

    # fc5: degenerate 1-wide-output matmul -> VPU multiply + XLU lane reduce.
    # Padded lanes of h4 and w5r are zero, so they contribute nothing.
    y = jnp.sum(h4 * w5r, axis=-1, keepdims=True)        # (N_pad, 1)

    # Lane-dense (unmasked) store: replicate across 128 lanes, add b5.
    o_ref[...] = jnp.broadcast_to(y, o_ref.shape) + b5r


def pack_params(params):
    """Pack the 10 FCNet parameter arrays into minimal (8,128)-aligned buffers."""
    vec = jnp.zeros((8, 256), dtype=jnp.float32)
    vec = vec.at[0, :80].set(params["w1"][0])        # w1 row
    vec = vec.at[1, :80].set(params["b1"][0])        # b1
    vec = vec.at[2, :160].set(params["b2"][0])       # b2
    vec = vec.at[3, :80].set(params["b3"][0])        # b3
    vec = vec.at[4, :40].set(params["b4"][0])        # b4
    vec = vec.at[5, :40].set(params["w5"][:, 0])     # w5 as a row
    vec = vec.at[6, :].set(params["b5"][0, 0])       # b5 replicated

    # Minimal padding: rows stay at real sizes (already multiples of 8),
    # lane (last) dims padded to the next multiple of 128.
    w2p = jnp.zeros((80, 256), WEIGHT_DTYPE).at[:, :160].set(
        params["w2"].astype(WEIGHT_DTYPE))
    w3p = jnp.zeros((160, 128), WEIGHT_DTYPE).at[:, :80].set(
        params["w3"].astype(WEIGHT_DTYPE))
    w4p = jnp.zeros((80, 128), WEIGHT_DTYPE).at[:, :40].set(
        params["w4"].astype(WEIGHT_DTYPE))
    return vec, w2p, w3p, w4p


@jax.jit
def fcnet_forward(x, vec, w2p, w3p, w4p):
    """x: (N, 1) f32.  vec/w2p/w3p/w4p: packed params from pack_params()."""
    N = x.shape[0]
    n_pad = ((N + 7) // 8) * 8                       # sublane-aligned batch
    x_pad = jnp.zeros((n_pad, 1), dtype=jnp.float32).at[:N, :].set(x)

    vmem = pl.BlockSpec(memory_space=pltpu.MemorySpace.VMEM)
    out_pad = pl.pallas_call(
        fcnet_kernel,
        out_shape=jax.ShapeDtypeStruct((n_pad, OUT_LANES), jnp.float32),
        in_specs=[vmem, vmem, vmem, vmem, vmem],
        out_specs=vmem,
    )(x_pad, vec, w2p, w3p, w4p)
    # jit fuses the pad above and this slice with the kernel dispatch.
    return out_pad[:N, 0:1]


def init_params(key):
    """Deterministic init matching FCNet.__init__ shapes:
    w ~ randn, b = zeros (except b5 ~ randn)."""
    k1, k2, k3, k4, k5, kb5 = jax.random.split(key, 6)
    return {
        "w1": jax.random.normal(k1, (1, 80), dtype=jnp.float32),
        "b1": jnp.zeros((1, 80), dtype=jnp.float32),
        "w2": jax.random.normal(k2, (80, 160), dtype=jnp.float32),
        "b2": jnp.zeros((1, 160), dtype=jnp.float32),
        "w3": jax.random.normal(k3, (160, 80), dtype=jnp.float32),
        "b3": jnp.zeros((1, 80), dtype=jnp.float32),
        "w4": jax.random.normal(k4, (80, 40), dtype=jnp.float32),
        "b4": jnp.zeros((1, 40), dtype=jnp.float32),
        "w5": jax.random.normal(k5, (40, 1), dtype=jnp.float32),
        "b5": jax.random.normal(kb5, (1, 1), dtype=jnp.float32),
    }


def fcnet_reference(x, p):
    """Pure-JAX reference for correctness check (unpadded, original shapes)."""
    h = jax.nn.sigmoid(x @ p["w1"] + p["b1"])
    h = jax.nn.relu(h @ p["w2"] + p["b2"])
    h = jax.nn.relu(h @ p["w3"] + p["b3"])
    h = jax.nn.relu(h @ p["w4"] + p["b4"])
    return h @ p["w5"] + p["b5"]


if __name__ == "__main__":
    key = jax.random.PRNGKey(0)
    kx, kp = jax.random.split(key)

    # The original script does x = x.reshape(100, 1)
    N = 100
    x = jax.random.normal(kx, (N, 1), dtype=jnp.float32)
    params = init_params(kp)
    vec, w2p, w3p, w4p = pack_params(params)   # one-time host-side packing

    out = fcnet_forward(x, vec, w2p, w3p, w4p)
    out = jax.block_until_ready(out)

    ref = fcnet_reference(x, params)
    assert out.shape == (N, 1)
    # Tolerance documents default TPU matmul precision (same in kernel & ref).
    assert jnp.allclose(out, ref, rtol=1e-4, atol=1e-4), "mismatch vs JAX reference"

    print("KERNEL_OK")
</pallas_src>

<mosaic_0001>
module attributes {stable_mosaic.version = 11 : i64} {
  func.func @fcnet_kernel(%arg0: memref<104x1xf32, #tpu.memory_space<vmem>>, %arg1: memref<8x256xf32, #tpu.memory_space<vmem>>, %arg2: memref<80x256xf32, #tpu.memory_space<vmem>>, %arg3: memref<160x128xf32, #tpu.memory_space<vmem>>, %arg4: memref<80x128xf32, #tpu.memory_space<vmem>>, %arg5: memref<104x128xf32, #tpu.memory_space<vmem>>) attributes {dimension_semantics = [], scalar_prefetch = 0 : i64, scratch_operands = 0 : i64, tpu.core_type = #tpu.core_type<tc>} {
    %c0 = arith.constant 0 : index
    %c0_0 = arith.constant 0 : index
    %0 = vector.load %arg0[%c0, %c0_0] : memref<104x1xf32, #tpu.memory_space<vmem>>, vector<104x1xf32>
    %c0_1 = arith.constant 0 : index
    %c0_2 = arith.constant 0 : index
    %1 = vector.load %arg1[%c0_1, %c0_2] : memref<8x256xf32, #tpu.memory_space<vmem>>, vector<8x256xf32>
    %2 = vector.extract_strided_slice %1 {offsets = [0, 0], sizes = [1, 80], strides = [1, 1]} : vector<8x256xf32> to vector<1x80xf32>
    %3 = vector.extract_strided_slice %1 {offsets = [1, 0], sizes = [1, 80], strides = [1, 1]} : vector<8x256xf32> to vector<1x80xf32>
    %4 = vector.extract_strided_slice %1 {offsets = [2, 0], sizes = [1, 256], strides = [1, 1]} : vector<8x256xf32> to vector<1x256xf32>
    %5 = vector.extract_strided_slice %1 {offsets = [3, 0], sizes = [1, 128], strides = [1, 1]} : vector<8x256xf32> to vector<1x128xf32>
    %6 = vector.extract_strided_slice %1 {offsets = [4, 0], sizes = [1, 128], strides = [1, 1]} : vector<8x256xf32> to vector<1x128xf32>
    %7 = vector.extract_strided_slice %1 {offsets = [5, 0], sizes = [1, 128], strides = [1, 1]} : vector<8x256xf32> to vector<1x128xf32>
    %8 = vector.extract_strided_slice %1 {offsets = [6, 0], sizes = [1, 128], strides = [1, 1]} : vector<8x256xf32> to vector<1x128xf32>
    %9 = vector.broadcast %0 : vector<104x1xf32> to vector<104x80xf32>
    %10 = vector.broadcast %2 : vector<1x80xf32> to vector<104x80xf32>
    %11 = arith.mulf %9, %10 : vector<104x80xf32>
    %12 = vector.broadcast %3 : vector<1x80xf32> to vector<104x80xf32>
    %13 = arith.addf %11, %12 : vector<104x80xf32>
    %cst = arith.constant 5.000000e-01 : f32
    %14 = vector.broadcast %cst : f32 to vector<104x80xf32>
    %15 = arith.mulf %14, %13 : vector<104x80xf32>
    %16 = math.tanh %15 : vector<104x80xf32>
    %cst_3 = arith.constant 5.000000e-01 : f32
    %17 = vector.broadcast %cst_3 : f32 to vector<104x80xf32>
    %18 = arith.mulf %17, %16 : vector<104x80xf32>
    %cst_4 = arith.constant 5.000000e-01 : f32
    %19 = vector.broadcast %cst_4 : f32 to vector<104x80xf32>
    %20 = arith.addf %18, %19 : vector<104x80xf32>
    %c0_5 = arith.constant 0 : index
    %c0_6 = arith.constant 0 : index
    %21 = vector.load %arg2[%c0_5, %c0_6] : memref<80x256xf32, #tpu.memory_space<vmem>>, vector<80x256xf32>
    %cst_7 = arith.constant dense<0.000000e+00> : vector<104x256xf32>
    %22 = tpu.matmul %20, %21, %cst_7 {dimension_numbers = #tpu.dot_dimension_numbers<[1], [0], [0], [1], [0, 0, 1, 1], [], []>} : vector<104x80xf32>, vector<80x256xf32>, vector<104x256xf32> -> vector<104x256xf32>
    %23 = vector.broadcast %4 : vector<1x256xf32> to vector<104x256xf32>
    %24 = arith.addf %22, %23 : vector<104x256xf32>
    %cst_8 = arith.constant 0.000000e+00 : f32
    %25 = vector.broadcast %cst_8 : f32 to vector<104x256xf32>
    %26 = arith.maximumf %24, %25 : vector<104x256xf32>
    %27 = vector.extract_strided_slice %26 {offsets = [0, 0], sizes = [104, 160], strides = [1, 1]} : vector<104x256xf32> to vector<104x160xf32>
    %c0_9 = arith.constant 0 : index
    %c0_10 = arith.constant 0 : index
    %28 = vector.load %arg3[%c0_9, %c0_10] : memref<160x128xf32, #tpu.memory_space<vmem>>, vector<160x128xf32>
    %cst_11 = arith.constant dense<0.000000e+00> : vector<104x128xf32>
    %29 = tpu.matmul %27, %28, %cst_11 {dimension_numbers = #tpu.dot_dimension_numbers<[1], [0], [0], [1], [0, 0, 1, 1], [], []>} : vector<104x160xf32>, vector<160x128xf32>, vector<104x128xf32> -> vector<104x128xf32>
    %30 = vector.broadcast %5 : vector<1x128xf32> to vector<104x128xf32>
    %31 = arith.addf %29, %30 : vector<104x128xf32>
    %cst_12 = arith.constant 0.000000e+00 : f32
    %32 = vector.broadcast %cst_12 : f32 to vector<104x128xf32>
    %33 = arith.maximumf %31, %32 : vector<104x128xf32>
    %34 = vector.extract_strided_slice %33 {offsets = [0, 0], sizes = [104, 80], strides = [1, 1]} : vector<104x128xf32> to vector<104x80xf32>
    %c0_13 = arith.constant 0 : index
    %c0_14 = arith.constant 0 : index
    %35 = vector.load %arg4[%c0_13, %c0_14] : memref<80x128xf32, #tpu.memory_space<vmem>>, vector<80x128xf32>
    %cst_15 = arith.constant dense<0.000000e+00> : vector<104x128xf32>
    %36 = tpu.matmul %34, %35, %cst_15 {dimension_numbers = #tpu.dot_dimension_numbers<[1], [0], [0], [1], [0, 0, 1, 1], [], []>} : vector<104x80xf32>, vector<80x128xf32>, vector<104x128xf32> -> vector<104x128xf32>
    %37 = vector.broadcast %6 : vector<1x128xf32> to vector<104x128xf32>
    %38 = arith.addf %36, %37 : vector<104x128xf32>
    %cst_16 = arith.constant 0.000000e+00 : f32
    %39 = vector.broadcast %cst_16 : f32 to vector<104x128xf32>
    %40 = arith.maximumf %38, %39 : vector<104x128xf32>
    %41 = vector.broadcast %7 : vector<1x128xf32> to vector<104x128xf32>
    %42 = arith.mulf %40, %41 : vector<104x128xf32>
    %cst_17 = arith.constant dense<0.000000e+00> : vector<104xf32>
    %43 = vector.multi_reduction <add>, %42, %cst_17 [1] : vector<104x128xf32> to vector<104xf32>
    %44 = vector.shape_cast %43 : vector<104xf32> to vector<104x1xf32>
    %45 = vector.shape_cast %44 : vector<104x1xf32> to vector<104x1xf32>
    %46 = vector.broadcast %45 : vector<104x1xf32> to vector<104x128xf32>
    %47 = vector.broadcast %8 : vector<1x128xf32> to vector<104x128xf32>
    %48 = arith.addf %46, %47 : vector<104x128xf32>
    %c0_18 = arith.constant 0 : index
    %c0_19 = arith.constant 0 : index
    %49 = vector.load %arg5[%c0_18, %c0_19] : memref<104x128xf32, #tpu.memory_space<vmem>>, vector<104x128xf32>
    tpu.vector_store %arg5[%c0_18, %c0_19], %48 {strides = array<i32>} : memref<104x128xf32, #tpu.memory_space<vmem>>, vector<104x128xf32>,
    return
  }
}

</mosaic_0001>

<bundles_post_ra>
// kernel: fcnet_forward.1
= control target key start
LH: loop header
LB: loop body
LE: loop exit
PB: predicated region body
PF: predicated region fallthrough
CT: control target
= control target key end

     0   :  { %10 = vsyncpa [#allocation3], 0  ;;  %s1699_s0 = inlined_call_operand.vmem [shape: f32[104,1], index: 0, kind: input, shape index: {}]   ;;  %s1700_s1 = inlined_call_operand.hbm [shape: f32[8,256], index: 1, kind: input, shape index: {}]   ;;  %s1701_s2 = inlined_call_operand.vmem [shape: f32[80,256], index: 2, kind: input, shape index: {}]   ;;  %s1702_s3 = inlined_call_operand.vmem [shape: f32[160,128], index: 3, kind: input, shape index: {}]   ;;  %s1703_s4 = inlined_call_operand.hbm [shape: f32[80,128], index: 4, kind: input, shape index: {}]   ;;  %s1704_s5 = inlined_call_operand.vmem [shape: f32[104,128], index: 5, kind: output, shape index: {}]  }
   0x1   :  { %11 = vsyncpa [#allocation5], 0  ;;  %s1211_s18 = smov [#allocation2]   ;;  %s1212_s20 = smov [#allocation4]  }
   0x2   :  { %s20_s19 = sshll.u32 %s1211_s18, 4  ;;  %s33_s21 = sshll.u32 %s1212_s20, 4  ;;  %s21_s19 = int_to_ptr.vmem [resolvable:$true] %s20_s19  ;;  %s1249_s21 = int_to_ptr.vmem [resolvable:$true] %s33_s21 }
   0x3   :  { %s1163_s24 = scalar_lea.hbm %s1700_s1, 256 }
   0x4   :  { %p1164_p0 = scmp.ne.s32.totalorder %s1700_s1, %s1163_s24  ;;  %p1167_p1 = scmp.lt.u32.totalorder %s1163_s24, %s1700_s1 }
   0x6   :  { %p1169_p2 = pnand %p1167_p1, %p1164_p0 }
   0x8   :  { %1172 = shalt.err (!%p1169_p2)
}
   0x9   :  { %s1173_s29 = scalar_lea.vmem %s21_s19, 256  ;;  %p1178_p4 = scmp.lt.s32.totalorder %s21_s19, %s21_s19 }
   0xa   :  { %p1174_p3 = scmp.ne.s32.totalorder %s21_s19, %s1173_s29  ;;  %p1179_p5 = scmp.lt.s32.totalorder %s1173_s29, %s1173_s29 }
   0xc   :  { %p1180_p6 = por %p1179_p5, %p1178_p4 }
   0xe   :  { %p1181_p7 = pnand %p1180_p6, %p1174_p3 }
  0x10   :  { %1184 = shalt.err (!%p1181_p7)
}
  0x11   :  { %23 = dma.hbm_to_vmem [thread:$0]  %s1700_s1, 256, %s21_s19, [#allocation3]  }
  0x12   :  { %s1185_s9 = scalar_lea.hbm %s1703_s4, 1280 }
  0x13   :  { %p1186_p8 = scmp.ne.s32.totalorder %s1703_s4, %s1185_s9  ;;  %p1189_p9 = scmp.lt.u32.totalorder %s1185_s9, %s1703_s4 }
  0x15   :  { %p1191_p10 = pnand %p1189_p9, %p1186_p8 }
  0x17   :  { %1194 = shalt.err (!%p1191_p10)
}
  0x18   :  { %s1195_s14 = scalar_lea.vmem %s1249_s21, 1280  ;;  %p1200_p12 = scmp.lt.s32.totalorder %s1249_s21, %s1249_s21 }
  0x19   :  { %p1196_p11 = scmp.ne.s32.totalorder %s1249_s21, %s1195_s14  ;;  %p1201_p13 = scmp.lt.s32.totalorder %s1195_s14, %s1195_s14 }
  0x1b   :  { %p1202_p0 = por %p1201_p13, %p1200_p12 }
  0x1d   :  { %p1203_p1 = pnand %p1202_p0, %p1196_p11 }
  0x1f   :  { %1206 = shalt.err (!%p1203_p1)
}
  0x20   :  { %s1213_s1 = smov 128   ;;  %s1214_s15 = smov 8  }
  0x21   :  { %39 = dma.hbm_to_vmem [thread:$0]  %s1703_s4, 1280, %s1249_s21, [#allocation5], %s1213_s1, %s1213_s1, %s1214_s15  }
  0x22   :  { %1207 = dma.done.wait [#allocation3], 256  }
  0x23   :  { %1208 = vsyncadd [#allocation3], 4294967040 }
  0x24   :  { %1209 = dma.done.wait [#allocation5], 1280  }
  0x25   :  { %1210 = vsyncadd [#allocation5], 4294966016  ;;  %v1215_v0 = vmov 0   ;;  %v48_v1 = vld [vmem:[%s1699_s0 + $0x10] sm:$0xff]  ;;  %v46_v2 = vld [vmem:[%s1699_s0] sm:$0xff]  ;;  %v1216_v44 = vmov 0.0  }
  0x26   :  { %1136 = vset.pattern.permute.xlu1 %v1215_v0  ;;  %1135 = vset.pattern.permute.xlu0 %v1215_v0  ;;  %v49_v3 = vld [vmem:[%s1699_s0 + $0x18] sm:$0xff]  ;;  %v47_v4 = vld [vmem:[%s1699_s0 + $0x8] sm:$0xff]  ;;  %v212_v8 = vld [vmem:[%s1701_s2] sm:$0xff]  ;;  %v1217_v48 = vmov 0.0|0.0   ;;  %vm240_vm0 = vcmask 654336   ;;  %vm473_vm1 = vcmask 261120  }
  0x27   :  { %73 = vperm.xlu1 %1136, %v48_v1   ;;  %63 = vperm.xlu0 %1135, %v46_v2   ;;  %v51_v5 = vld [vmem:[%s1699_s0 + $0x28] sm:$0xff]  ;;  %v215_v7 = vld [vmem:[%s1701_s2 + $0x18] sm:$0xff]  ;;  %v214_v9 = vld [vmem:[%s1701_s2 + $0x10] sm:$0xff]  ;;  %vm1218_vm2 = vmmov 0  }
  0x28   :  { %v213_v6 = vld [vmem:[%s1701_s2 + $0x8] sm:$0xff]  ;;  %v50_v10 = vld [vmem:[%s1699_s0 + $0x20] sm:$0xff]  ;;  %v1054_v12 = vpack.c.bf16 %v214_v9, %v212_v8  ;;  %v219_v14 = vld [vmem:[%s1701_s2 + $0x38] sm:$0xff]  ;;  %344 = vmatprep.mubr.f32.mxu0 %v1216_v44  ;;  %1072 = vmatprep.subr.bf16.mxu1 %v1217_v48 }
  0x29   :  { %v1052_v11 = vpack.c.bf16 %v215_v7, %v213_v6  ;;  %v217_v13 = vld [vmem:[%s1701_s2 + $0x28] sm:$0xff]  ;;  %v216_v16 = vld [vmem:[%s1701_s2 + $0x20] sm:$0xff]  ;;  %v218_v17 = vld [vmem:[%s1701_s2 + $0x30] sm:$0xff]  ;;  %v126_v6 = vlaneseq }
  0x2a   :  { %v1056_v15 = vpack.c.bf16 %v219_v14, %v217_v13  ;;  %v221_v18 = vld [vmem:[%s1701_s2 + $0x48] sm:$0xff]  ;;  %v223_v19 = vld [vmem:[%s1701_s2 + $0x58] sm:$0xff]  ;;  %v52_v21 = vld [vmem:[%s1699_s0 + $0x30] sm:$0xff]  ;;  %v1058_v22 = vpack.c.bf16 %v218_v17, %v216_v16 }
  0x2b   :  { %78 = vperm.xlu1 %1136, %v49_v3   ;;  %68 = vperm.xlu0 %1135, %v47_v4   ;;  %v53_v20 = vld [vmem:[%s1699_s0 + $0x38] sm:$0xff]  ;;  %v1060_v23 = vpack.c.bf16 %v223_v19, %v221_v18  ;;  %v220_v24 = vld [vmem:[%s1701_s2 + $0x40] sm:$0xff]  ;;  %v222_v25 = vld [vmem:[%s1701_s2 + $0x50] sm:$0xff]  ;;  %v1438_v7 = vshrl.u32 %v126_v6, 7 }
  0x2c   :  { %1053 = vmatprep.subr.bf16.mxu0 %v1052_v11  ;;  %v225_v26 = vld [vmem:[%s1701_s2 + $0x68] sm:$0xff]  ;;  %v227_v27 = vld [vmem:[%s1701_s2 + $0x78] sm:$0xff]  ;;  %v54_v29 = vld [vmem:[%s1699_s0 + $0x40] sm:$0xff]  ;;  %v1062_v30 = vpack.c.bf16 %v222_v25, %v220_v24 }
  0x2d   :  { %1055 = vmatpush1.bf16.msra.mxu0 %v1054_v12  ;;  %v55_v28 = vld [vmem:[%s1699_s0 + $0x48] sm:$0xff]  ;;  %v1064_v31 = vpack.c.bf16 %v227_v27, %v225_v26  ;;  %v224_v32 = vld [vmem:[%s1701_s2 + $0x60] sm:$0xff]  ;;  %v226_v33 = vld [vmem:[%s1701_s2 + $0x70] sm:$0xff]  ;;  %v128_v8 = vsub.s32 0, %v1438_v7 }
  0x2e   :  { %1057 = vmatprep.subr.bf16.mxu0 %v1056_v15  ;;  %v229_v34 = vld [vmem:[%s1701_s2 + $0x88] sm:$0xff]  ;;  %v231_v35 = vld [vmem:[%s1701_s2 + $0x98] sm:$0xff]  ;;  %v56_v37 = vld [vmem:[%s1699_s0 + $0x50] sm:$0xff]  ;;  %v1066_v38 = vpack.c.bf16 %v226_v33, %v224_v32 }
  0x2f   :  { %88 = vperm.xlu1 %1136, %v51_v5   ;;  %83 = vperm.xlu0 %1135, %v50_v10   ;;  %v57_v36 = vld [vmem:[%s1699_s0 + $0x58] sm:$0xff]  ;;  %v1068_v39 = vpack.c.bf16 %v231_v35, %v229_v34  ;;  %v228_v40 = vld [vmem:[%s1701_s2 + $0x80] sm:$0xff]  ;;  %v230_v41 = vld [vmem:[%s1701_s2 + $0x90] sm:$0xff]  ;;  %v145_v10 = vsub.s32 1, %v1438_v7 }
  0x30   :  { %v58_v42 = vld [vmem:[%s1699_s0 + $0x60] sm:$0xff]  ;;  %v1070_v43 = vpack.c.bf16 %v230_v41, %v228_v40  ;;  %v450_v46 = vld [vmem:[%s1702_s3 + $0x8] sm:$0xff]  ;;  %v451_v47 = vld [vmem:[%s1702_s3 + $0x10] sm:$0xff] }
  0x31   :  { %1059 = vmatpush1.bf16.msra.mxu0 %v1058_v22  ;;  %v449_v45 = vld [vmem:[%s1702_s3] sm:$0xff]  ;;  %v452_v50 = vld [vmem:[%s1702_s3 + $0x18] sm:$0xff]  ;;  %v454_v53 = vld [vmem:[%s1702_s3 + $0x28] sm:$0xff] }
  0x32   :  { %1061 = vmatprep.subr.bf16.mxu0 %v1060_v23  ;;  %v1073_v49 = vpack.c.bf16 %v450_v46, %v449_v45  ;;  %v1076_v51 = vpack.c.bf16 %v452_v50, %v451_v47  ;;  %v453_v52 = vld [vmem:[%s1702_s3 + $0x20] sm:$0xff]  ;;  %v455_v55 = vld [vmem:[%s1702_s3 + $0x30] sm:$0xff]  ;;  %v456_v56 = vld [vmem:[%s1702_s3 + $0x38] sm:$0xff] }
  0x33   :  { %98 = vperm.xlu1 %1136, %v53_v20   ;;  %93 = vperm.xlu0 %1135, %v52_v21   ;;  %v1079_v54 = vpack.c.bf16 %v454_v53, %v453_v52  ;;  %v1082_v57 = vpack.c.bf16 %v456_v56, %v455_v55  ;;  %v457_v58 = vld [vmem:[%s1702_s3 + $0x40] sm:$0xff]  ;;  %v458_v59 = vld [vmem:[%s1702_s3 + $0x48] sm:$0xff]  ;;  %v459_v61 = vld [vmem:[%s1702_s3 + $0x50] sm:$0xff] }
  0x34   :  { %1074 = vmatpush1.bf16.msra.mxu1 %v1073_v49  ;;  %v1085_v60 = vpack.c.bf16 %v458_v59, %v457_v58  ;;  %v460_v62 = vld [vmem:[%s1702_s3 + $0x58] sm:$0xff]  ;;  %v461_v0 = vld [vmem:[%s1702_s3 + $0x60] sm:$0xff]  ;;  %v462_v1 = vld [vmem:[%s1702_s3 + $0x68] sm:$0xff] }
  0x35   :  { %1063 = vmatpush1.bf16.msra.mxu0 %v1062_v30  ;;  %1075 = vmatprep.subr.bf16.mxu1 %v1217_v48  ;;  %v1088_v63 = vpack.c.bf16 %v460_v62, %v459_v61  ;;  %v1091_v2 = vpack.c.bf16 %v462_v1, %v461_v0  ;;  %v463_v3 = vld [vmem:[%s1702_s3 + $0x70] sm:$0xff]  ;;  %v464_v4 = vld [vmem:[%s1702_s3 + $0x78] sm:$0xff]  ;;  %v1441_v9 = vld [vmem:[#allocation2] sm:$0xff] }
  0x36   :  { %1065 = vmatprep.subr.bf16.mxu0 %v1064_v31  ;;  %v1094_v5 = vpack.c.bf16 %v464_v4, %v463_v3  ;;  %v1445_v11 = vrot.slane %v1441_v9, %v128_v8  ;;  %v1448_v12 = vrot.slane %v1441_v9, %v145_v10 }
  0x37   :  { %108 = vperm.xlu1 %1136, %v55_v28   ;;  %103 = vperm.xlu0 %1135, %v54_v29  }
  0x38   :  { %1077 = vmatpush1.bf16.msra.mxu1 %v1076_v51 }
  0x39   :  { %1067 = vmatpush1.bf16.msra.mxu0 %v1066_v38  ;;  %1078 = vmatprep.subr.bf16.mxu1 %v1217_v48 }
  0x3a   :  { %1069 = vmatprep.subr.bf16.mxu0 %v1068_v39 }
  0x3b   :  { %118 = vperm.xlu1 %1136, %v57_v36   ;;  %113 = vperm.xlu0 %1135, %v56_v37  }
  0x3c   :  { %1080 = vmatpush1.bf16.msra.mxu1 %v1079_v54 }
  0x3d   :  { %1071 = vmatpush1.bf16.msra.mxu0 %v1070_v43  ;;  %1081 = vmatprep.subr.bf16.mxu1 %v1217_v48 }
  0x3e   :  { %1102 = vmatprep.subr.bf16.mxu0 %v1217_v48 }
  0x3f   :  { %123 = vperm.xlu0 %1135, %v58_v42  }
  0x40   :  { %1083 = vmatpush1.bf16.msra.mxu1 %v1082_v57 }
  0x41   :  { %1084 = vmatprep.subr.bf16.mxu1 %v1217_v48 }
  0x44   :  { %1086 = vmatpush1.bf16.msra.mxu1 %v1085_v60 }
  0x45   :  { %1087 = vmatprep.subr.bf16.mxu1 %v1217_v48 }
  0x48   :  { %1089 = vmatpush1.bf16.msra.mxu1 %v1088_v63 }
  0x49   :  { %1090 = vmatprep.subr.bf16.mxu1 %v1217_v48 }
  0x4c   :  { %1092 = vmatpush1.bf16.msra.mxu1 %v1091_v2 }
  0x4d   :  { %1093 = vmatprep.subr.bf16.mxu1 %v1217_v48 }
  0x50   :  { %1095 = vmatpush1.bf16.msra.mxu1 %v1094_v5 }
  0x51   :  { %1096 = vmatprep.subr.bf16.mxu1 %v1217_v48 }
  0xa6   :  { %v74_v13 = vpop.permute.xlu1 %73  ;;  %v64_v14 = vpop.permute.xlu0 %63 }
  0xa7   :  { %v132_v15 = vmul.f32 %v1445_v11, %v74_v13  ;;  %v130_v16 = vmul.f32 %v1445_v11, %v64_v14 }
  0xa9   :  { %v149_v17 = vadd.f32 %v1448_v12, %v132_v15  ;;  %v147_v18 = vadd.f32 %v1448_v12, %v130_v16 }
  0xaa   :  { %v79_v19 = vpop.permute.xlu1 %78  ;;  %v69_v20 = vpop.permute.xlu0 %68 }
  0xab   :  { %v160_v21 = vmul.f32 0.5, %v147_v18  ;;  %v133_v22 = vmul.f32 %v1445_v11, %v79_v19  ;;  %v131_v23 = vmul.f32 %v1445_v11, %v69_v20  ;;  %v162_v24 = vmul.f32 0.5, %v149_v17 }
  0xad   :  { %v148_v25 = vadd.f32 %v1448_v12, %v131_v23  ;;  %1137 = vtanh.f32 %v160_v21  ;;  %v150_v26 = vadd.f32 %v1448_v12, %v133_v22 }
  0xae   :  { %v84_v27 = vpop.permute.xlu0 %83  ;;  %v89_v29 = vpop.permute.xlu1 %88  ;;  %1139 = vtanh.f32 %v162_v24 }
  0xaf   :  { %v161_v28 = vmul.f32 0.5, %v148_v25  ;;  %v134_v30 = vmul.f32 %v1445_v11, %v84_v27  ;;  %v163_v31 = vmul.f32 0.5, %v150_v26  ;;  %v135_v32 = vmul.f32 %v1445_v11, %v89_v29 }
  0xb1   :  { %1141 = vtanh.f32 %v161_v28  ;;  %v151_v33 = vadd.f32 %v1448_v12, %v134_v30  ;;  %v152_v35 = vadd.f32 %v1448_v12, %v135_v32 }
  0xb2   :  { %v94_v34 = vpop.permute.xlu0 %93  ;;  %1143 = vtanh.f32 %v163_v31  ;;  %v99_v38 = vpop.permute.xlu1 %98 }
  0xb3   :  { %v164_v36 = vmul.f32 0.5, %v151_v33  ;;  %v136_v37 = vmul.f32 %v1445_v11, %v94_v34  ;;  %v165_v42 = vmul.f32 0.5, %v152_v35  ;;  %v137_v43 = vmul.f32 %v1445_v11, %v99_v38 }
  0xb5   :  { %1145 = vtanh.f32 %v164_v36  ;;  %v153_v45 = vadd.f32 %v1448_v12, %v136_v37  ;;  %v154_v52 = vadd.f32 %v1448_v12, %v137_v43 }
  0xb6   :  { %v104_v47 = vpop.permute.xlu0 %103  ;;  %1147 = vtanh.f32 %v165_v42  ;;  %v109_v56 = vpop.permute.xlu1 %108 }
  0xb7   :  { %v1138_v39 = vpop.eup %1137  ;;  %v166_v53 = vmul.f32 0.5, %v153_v45  ;;  %v138_v54 = vmul.f32 %v1445_v11, %v104_v47  ;;  %v167_v59 = vmul.f32 0.5, %v154_v52  ;;  %v139_v60 = vmul.f32 %v1445_v11, %v109_v56  ;;  %v465_v45 = vld [vmem:[%s1702_s3 + $0x80] sm:$0xff]  ;;  %v656_v52 = vld [vmem:[#allocation4] sm:$0xff]  ;;  %v659_v56 = vld [vmem:[#allocation4 + $0x18] sm:$0xff] }
  0xb8   :  { %v186_v40 = vmul.f32 0.5, %v1138_v39  ;;  %v1140_v41 = vpop.eup %1139 }
  0xb9   :  { %v188_v50 = vmul.f32 0.5, %v1140_v41  ;;  %1149 = vtanh.f32 %v166_v53  ;;  %v155_v61 = vadd.f32 %v1448_v12, %v138_v54  ;;  %v156_v1 = vadd.f32 %v1448_v12, %v139_v60  ;;  %v657_v53 = vld [vmem:[#allocation4 + $0x8] sm:$0xff]  ;;  %v658_v54 = vld [vmem:[#allocation4 + $0x10] sm:$0xff] }
  0xba   :  { %v199_v46 = vadd.f32 0.5, %v186_v40  ;;  %v114_v63 = vpop.permute.xlu0 %113  ;;  %1151 = vtanh.f32 %v167_v59  ;;  %v119_v6 = vpop.permute.xlu1 %118  ;;  %v661_v59 = vld [vmem:[#allocation4 + $0x28] sm:$0xff] }
  0xbb   :  { %v1142_v49 = vpop.eup %1141  ;;  %v201_v58 = vadd.f32 0.5, %v188_v50  ;;  %v168_v2 = vmul.f32 0.5, %v155_v61  ;;  %v140_v3 = vmul.f32 %v1445_v11, %v114_v63  ;;  %v169_v10 = vmul.f32 0.5, %v156_v1  ;;  %v468_v50 = vld [vmem:[%s1702_s3 + $0x98] sm:$0xff]  ;;  %v662_v61 = vld [vmem:[#allocation4 + $0x30] sm:$0xff]  ;;  %v60_v1 = vld [vmem:[#allocation2 + $0x8] sm:$0xff] }
  0xbc   :  { %v187_v51 = vmul.f32 0.5, %v1142_v49  ;;  %931 = vmatmul.mubr.msk.f32.vlgmr.msra.gmra.mrb[0].mxu0 %vm240_vm0, %v199_v46  ;;  %v1144_v57 = vpop.eup %1143  ;;  %v141_v13 = vmul.f32 %v1445_v11, %v119_v6  ;;  %v466_v46 = vld [vmem:[%s1702_s3 + $0x88] sm:$0xff]  ;;  %v467_v49 = vld [vmem:[%s1702_s3 + $0x90] sm:$0xff] }
  0xbd   :  { %350 = vmatprep.mubr.f32.mxu0 %v1216_v44  ;;  %v189_v62 = vmul.f32 0.5, %v1144_v57  ;;  %1153 = vtanh.f32 %v168_v2  ;;  %v157_v14 = vadd.f32 %v1448_v12, %v140_v3  ;;  %v1097_v47 = vpack.c.bf16 %v466_v46, %v465_v45 }
  0xbe   :  { %v200_v55 = vadd.f32 0.5, %v187_v51  ;;  %v124_v17 = vpop.permute.xlu0 %123  ;;  %1155 = vtanh.f32 %v169_v10  ;;  %v158_v19 = vadd.f32 %v1448_v12, %v141_v13  ;;  %v1100_v51 = vpack.c.bf16 %v468_v50, %v467_v49 }
  0xbf   :  { %v1146_v0 = vpop.eup %1145  ;;  %v202_v4 = vadd.f32 0.5, %v189_v62  ;;  %v170_v20 = vmul.f32 0.5, %v157_v14  ;;  %v142_v21 = vmul.f32 %v1445_v11, %v124_v17  ;;  %1098 = vmatpush1.bf16.msra.mxu1 %v1097_v47  ;;  %v1106_v57 = vpack.c.bf16 %v659_v56, %v658_v54  ;;  %v663_v62 = vld [vmem:[#allocation4 + $0x38] sm:$0xff] }
  0xc0   :  { %932 = vmatmul.mubr.msk.f32.gmra.mrb[2].mxu0 %vm240_vm0, %v200_v55  ;;  %v190_v5 = vmul.f32 0.5, %v1146_v0  ;;  %v1148_v8 = vpop.eup %1147  ;;  %v171_v25 = vmul.f32 0.5, %v158_v19  ;;  %1099 = vmatprep.subr.bf16.mxu1 %v1217_v48  ;;  %v1103_v55 = vpack.c.bf16 %v657_v53, %v656_v52  ;;  %v1112_v63 = vpack.c.bf16 %v663_v62, %v662_v61 }
  0xc1   :  { %356 = vmatprep.mubr.f32.mxu0 %v1216_v44  ;;  %v191_v15 = vmul.f32 0.5, %v1148_v8  ;;  %1157 = vtanh.f32 %v170_v20  ;;  %v159_v26 = vadd.f32 %v1448_v12, %v142_v21  ;;  %v234_v0 = vsub.s32 2, %v1438_v7 }
  0xc2   :  { %v203_v16 = vadd.f32 0.5, %v190_v5  ;;  %1159 = vtanh.f32 %v171_v25  ;;  %1104 = vmatpush3.bf16.msra.mxu0 %v1103_v55 }
  0xc3   :  { %v1150_v18 = vpop.eup %1149  ;;  %v204_v22 = vadd.f32 0.5, %v191_v15  ;;  %v172_v11 = vmul.f32 0.5, %v159_v26  ;;  %1101 = vmatpush1.bf16.msra.mxu1 %v1100_v51  ;;  %1105 = vmatprep.subr.bf16.mxu0 %v1217_v48  ;;  %v1521_v2 = vrot.slane %v1441_v9, %v234_v0  ;;  %v1523_v3 = vrot.slane %v60_v1, %v234_v0 }
  0xc4   :  { %933 = vmatmul.mubr.msk.f32.gmra.mrb[4].mxu0 %vm240_vm0, %v201_v58  ;;  %v192_v23 = vmul.f32 0.5, %v1150_v18  ;;  %v1152_v24 = vpop.eup %1151  ;;  %1117 = vmatprep.subr.bf16.mxu1 %v1217_v48  ;;  %v660_v58 = vld [vmem:[#allocation4 + $0x20] sm:$0xff] }
  0xc5   :  { %362 = vmatprep.mubr.f32.mxu0 %v1216_v44  ;;  %v193_v27 = vmul.f32 0.5, %v1152_v24  ;;  %1161 = vtanh.f32 %v172_v11  ;;  %v1109_v60 = vpack.c.bf16 %v661_v59, %v660_v58 }
  0xc6   :  { %v205_v28 = vadd.f32 0.5, %v192_v23  ;;  %1107 = vmatpush3.bf16.msra.mxu0 %v1106_v57 }
  0xc7   :  { %v1154_v29 = vpop.eup %1153  ;;  %v206_v30 = vadd.f32 0.5, %v193_v27  ;;  %1108 = vmatprep.subr.bf16.mxu0 %v1217_v48 }
  0xc8   :  { %934 = vmatmul.mubr.msk.f32.gmra.mrb[6].mxu0 %vm240_vm0, %v202_v4  ;;  %v194_v31 = vmul.f32 0.5, %v1154_v29  ;;  %v1156_v32 = vpop.eup %1155 }
  0xc9   :  { %368 = vmatprep.mubr.f32.mxu0 %v1216_v44  ;;  %v195_v12 = vmul.f32 0.5, %v1156_v32 }
  0xca   :  { %v207_v33 = vadd.f32 0.5, %v194_v31  ;;  %1110 = vmatpush3.bf16.msra.mxu0 %v1109_v60 }
  0xcb   :  { %v1158_v34 = vpop.eup %1157  ;;  %v208_v35 = vadd.f32 0.5, %v195_v12  ;;  %1111 = vmatprep.subr.bf16.mxu0 %v1217_v48 }
  0xcc   :  { %935 = vmatmul.mubr.msk.f32.gmra.mrb[8].mxu0 %vm240_vm0, %v203_v16  ;;  %v196_v36 = vmul.f32 0.5, %v1158_v34  ;;  %v1160_v37 = vpop.eup %1159 }
  0xcd   :  { %374 = vmatprep.mubr.f32.mxu0 %v1216_v44  ;;  %v197_v38 = vmul.f32 0.5, %v1160_v37 }
  0xce   :  { %v209_v39 = vadd.f32 0.5, %v196_v36  ;;  %1113 = vmatpush3.bf16.msra.mxu0 %v1112_v63 }
  0xcf   :  { %v1162_v40 = vpop.eup %1161  ;;  %v210_v41 = vadd.f32 0.5, %v197_v38  ;;  %1114 = vmatprep.subr.bf16.mxu0 %v1217_v48 }
  0xd0   :  { %936 = vmatmul.mubr.msk.f32.gmra.mrb[10].mxu0 %vm240_vm0, %v204_v22  ;;  %v198_v42 = vmul.f32 0.5, %v1162_v40 }
  0xd1   :  { %380 = vmatprep.mubr.f32.mxu0 %v1216_v44 }
  0xd2   :  { %v211_v43 = vadd.f32 0.5, %v198_v42 }
  0xd4   :  { %937 = vmatmul.mubr.msk.f32.gmra.mrb[12].mxu0 %vm240_vm0, %v205_v28 }
  0xd5   :  { %386 = vmatprep.mubr.f32.mxu0 %v1216_v44 }
  0xd8   :  { %938 = vmatmul.mubr.msk.f32.gmra.mrb[14].mxu0 %vm240_vm0, %v206_v30 }
  0xd9   :  { %392 = vmatprep.mubr.f32.mxu0 %v1216_v44 }
  0xdc   :  { %939 = vmatmul.mubr.msk.f32.gmra.mrb[16].mxu0 %vm240_vm0, %v207_v33 }
  0xdd   :  { %398 = vmatprep.mubr.f32.mxu0 %v1216_v44 }
  0xe0   :  { %940 = vmatmul.mubr.msk.f32.gmra.mrb[18].mxu0 %vm240_vm0, %v208_v35 }
  0xe1   :  { %404 = vmatprep.mubr.f32.mxu0 %v1216_v44 }
  0xe4   :  { %941 = vmatmul.mubr.msk.f32.gmra.mrb[20].mxu0 %vm240_vm0, %v209_v39 }
  0xe5   :  { %410 = vmatprep.mubr.f32.mxu0 %v1216_v44 }
  0xe8   :  { %942 = vmatmul.mubr.msk.f32.gmra.mrb[22].mxu0 %vm240_vm0, %v210_v41 }
  0xe9   :  { %416 = vmatprep.mubr.f32.mxu0 %v1216_v44 }
  0xec   :  { %943 = vmatmul.mubr.msk.f32.gmra.mrb[24].mxu0 %vm240_vm0, %v211_v43 }
  0xed   :  { %1013 = vmatprep.mubr.msk.f32.mxu0 %vm1218_vm2, %v1216_v44 }
 0x18f   :  { %v346_v4 = vpop.f32.mrb[0].mxu0 }
 0x190   :  { %v347_v5 = vadd.f32 %v346_v4, %v1521_v2  ;;  %v348_v6 = vpop.f32.mrb[1].mxu0 }
 0x191   :  { %v349_v8 = vadd.f32 %v348_v6, %v1523_v3 }
 0x192   :  { %v423_v14 = vmax.f32 %v347_v5, 0.0 }
 0x193   :  { %v424_v10 = vmax.f32 %v349_v8, 0.0  ;;  %v352_v13 = vpop.f32.mrb[2].mxu0 }
 0x194   :  { %v353_v15 = vadd.f32 %v352_v13, %v1521_v2  ;;  %v354_v16 = vpop.f32.mrb[3].mxu0 }
 0x195   :  { %v355_v17 = vadd.f32 %v354_v16, %v1523_v3  ;;  %944 = vmatprep.mubr.msk.f32.mxu1 %vm473_vm1, %v424_v10 }
 0x196   :  { %578 = vmatmul.mubr.f32.vlgmr.msra.gmra.mrb[0].mxu1 %v423_v14  ;;  %v425_v20 = vmax.f32 %v353_v15, 0.0 }
 0x197   :  { %v426_v18 = vmax.f32 %v355_v17, 0.0  ;;  %v358_v19 = vpop.f32.mrb[4].mxu0  ;;  %1122 = vmatpush3.bf16.msra.mxu1 %v1103_v55 }
 0x198   :  { %v359_v21 = vadd.f32 %v358_v19, %v1521_v2  ;;  %v360_v22 = vpop.f32.mrb[5].mxu0  ;;  %1118 = vmatprep.subr.bf16.mxu1 %v1217_v48 }
 0x199   :  { %v361_v23 = vadd.f32 %v360_v22, %v1523_v3  ;;  %945 = vmatprep.mubr.msk.f32.mxu1 %vm473_vm1, %v426_v18 }
 0x19a   :  { %583 = vmatmul.mubr.f32.gmra.mrb[2].mxu1 %v425_v20  ;;  %v427_v26 = vmax.f32 %v359_v21, 0.0 }
 0x19b   :  { %v428_v24 = vmax.f32 %v361_v23, 0.0  ;;  %v364_v25 = vpop.f32.mrb[6].mxu0  ;;  %1123 = vmatpush3.bf16.msra.mxu1 %v1106_v57 }
 0x19c   :  { %v365_v27 = vadd.f32 %v364_v25, %v1521_v2  ;;  %v366_v28 = vpop.f32.mrb[7].mxu0  ;;  %1119 = vmatprep.subr.bf16.mxu1 %v1217_v48 }
 0x19d   :  { %v367_v29 = vadd.f32 %v366_v28, %v1523_v3  ;;  %946 = vmatprep.mubr.msk.f32.mxu1 %vm473_vm1, %v428_v24  ;;  %v665_v28 = vld [vmem:[#allocation4 + $0x48] sm:$0xff] }
 0x19e   :  { %588 = vmatmul.mubr.f32.gmra.mrb[4].mxu1 %v427_v26  ;;  %v429_v31 = vmax.f32 %v365_v27, 0.0  ;;  %v664_v27 = vld [vmem:[#allocation4 + $0x40] sm:$0xff] }
 0x19f   :  { %v430_v11 = vmax.f32 %v367_v29, 0.0  ;;  %v370_v30 = vpop.f32.mrb[8].mxu0  ;;  %1124 = vmatpush3.bf16.msra.mxu1 %v1109_v60  ;;  %v1115_v29 = vpack.c.bf16 %v665_v28, %v664_v27 }
 0x1a0   :  { %v371_v32 = vadd.f32 %v370_v30, %v1521_v2  ;;  %v372_v12 = vpop.f32.mrb[9].mxu0  ;;  %1120 = vmatprep.subr.bf16.mxu1 %v1217_v48 }
 0x1a1   :  { %v373_v33 = vadd.f32 %v372_v12, %v1523_v3  ;;  %947 = vmatprep.mubr.msk.f32.mxu1 %vm473_vm1, %v430_v11  ;;  %1116 = vmatpush3.bf16.msra.mxu0 %v1115_v29 }
 0x1a2   :  { %593 = vmatmul.mubr.f32.gmra.mrb[6].mxu1 %v429_v31  ;;  %v431_v36 = vmax.f32 %v371_v32, 0.0 }
 0x1a3   :  { %v432_v34 = vmax.f32 %v373_v33, 0.0  ;;  %v376_v35 = vpop.f32.mrb[10].mxu0  ;;  %1125 = vmatpush3.bf16.msra.mxu1 %v1112_v63 }
 0x1a4   :  { %v377_v37 = vadd.f32 %v376_v35, %v1521_v2  ;;  %v378_v38 = vpop.f32.mrb[11].mxu0  ;;  %1121 = vmatprep.subr.bf16.mxu1 %v1217_v48 }
 0x1a5   :  { %v379_v39 = vadd.f32 %v378_v38, %v1523_v3  ;;  %948 = vmatprep.mubr.msk.f32.mxu1 %vm473_vm1, %v432_v34 }
 0x1a6   :  { %598 = vmatmul.mubr.f32.gmra.mrb[8].mxu1 %v431_v36  ;;  %v433_v42 = vmax.f32 %v377_v37, 0.0 }
 0x1a7   :  { %v434_v40 = vmax.f32 %v379_v39, 0.0  ;;  %v382_v41 = vpop.f32.mrb[12].mxu0  ;;  %1126 = vmatpush3.bf16.msra.mxu1 %v1115_v29 }
 0x1a8   :  { %v383_v43 = vadd.f32 %v382_v41, %v1521_v2  ;;  %v384_v45 = vpop.f32.mrb[13].mxu0 }
 0x1a9   :  { %v385_v46 = vadd.f32 %v384_v45, %v1523_v3  ;;  %949 = vmatprep.mubr.msk.f32.mxu1 %vm473_vm1, %v434_v40 }
 0x1aa   :  { %603 = vmatmul.mubr.f32.gmra.mrb[10].mxu1 %v433_v42  ;;  %v435_v50 = vmax.f32 %v383_v43, 0.0 }
 0x1ab   :  { %v436_v47 = vmax.f32 %v385_v46, 0.0  ;;  %v388_v49 = vpop.f32.mrb[14].mxu0 }
 0x1ac   :  { %v389_v48 = vadd.f32 %v388_v49, %v1521_v2  ;;  %v390_v51 = vpop.f32.mrb[15].mxu0 }
 0x1ad   :  { %v391_v52 = vadd.f32 %v390_v51, %v1523_v3  ;;  %950 = vmatprep.mubr.msk.f32.mxu1 %vm473_vm1, %v436_v47 }
 0x1ae   :  { %608 = vmatmul.mubr.f32.gmra.mrb[12].mxu1 %v435_v50  ;;  %v437_v55 = vmax.f32 %v389_v48, 0.0 }
 0x1af   :  { %v438_v53 = vmax.f32 %v391_v52, 0.0  ;;  %v394_v54 = vpop.f32.mrb[16].mxu0 }
 0x1b0   :  { %v395_v56 = vadd.f32 %v394_v54, %v1521_v2  ;;  %v396_v57 = vpop.f32.mrb[17].mxu0 }
 0x1b1   :  { %v397_v58 = vadd.f32 %v396_v57, %v1523_v3  ;;  %951 = vmatprep.mubr.msk.f32.mxu1 %vm473_vm1, %v438_v53 }
 0x1b2   :  { %613 = vmatmul.mubr.f32.gmra.mrb[14].mxu1 %v437_v55  ;;  %v439_v61 = vmax.f32 %v395_v56, 0.0 }
 0x1b3   :  { %v440_v59 = vmax.f32 %v397_v58, 0.0  ;;  %v400_v60 = vpop.f32.mrb[18].mxu0 }
 0x1b4   :  { %v401_v62 = vadd.f32 %v400_v60, %v1521_v2  ;;  %v402_v63 = vpop.f32.mrb[19].mxu0 }
 0x1b5   :  { %v403_v0 = vadd.f32 %v402_v63, %v1523_v3  ;;  %952 = vmatprep.mubr.msk.f32.mxu1 %vm473_vm1, %v440_v59 }
 0x1b6   :  { %618 = vmatmul.mubr.f32.gmra.mrb[16].mxu1 %v439_v61  ;;  %v441_v5 = vmax.f32 %v401_v62, 0.0 }
 0x1b7   :  { %v442_v1 = vmax.f32 %v403_v0, 0.0  ;;  %v406_v4 = vpop.f32.mrb[20].mxu0 }
 0x1b8   :  { %v407_v6 = vadd.f32 %v406_v4, %v1521_v2  ;;  %v408_v8 = vpop.f32.mrb[21].mxu0 }
 0x1b9   :  { %v409_v10 = vadd.f32 %v408_v8, %v1523_v3  ;;  %953 = vmatprep.mubr.msk.f32.mxu1 %vm473_vm1, %v442_v1 }
 0x1ba   :  { %623 = vmatmul.mubr.f32.gmra.mrb[18].mxu1 %v441_v5  ;;  %v443_v15 = vmax.f32 %v407_v6, 0.0 }
 0x1bb   :  { %v444_v13 = vmax.f32 %v409_v10, 0.0  ;;  %v412_v14 = vpop.f32.mrb[22].mxu0 }
 0x1bc   :  { %v413_v16 = vadd.f32 %v412_v14, %v1521_v2  ;;  %v414_v17 = vpop.f32.mrb[23].mxu0 }
 0x1bd   :  { %v415_v18 = vadd.f32 %v414_v17, %v1523_v3  ;;  %954 = vmatprep.mubr.msk.f32.mxu1 %vm473_vm1, %v444_v13 }
 0x1be   :  { %628 = vmatmul.mubr.f32.gmra.mrb[20].mxu1 %v443_v15  ;;  %v445_v21 = vmax.f32 %v413_v16, 0.0 }
 0x1bf   :  { %v446_v19 = vmax.f32 %v415_v18, 0.0  ;;  %v418_v20 = vpop.f32.mrb[24].mxu0 }
 0x1c0   :  { %v419_v22 = vadd.f32 %v418_v20, %v1521_v2  ;;  %v420_v23 = vpop.f32.mrb[25].mxu0  ;;  %v471_v2 = vsub.s32 3, %v1438_v7 }
 0x1c1   :  { %v421_v24 = vadd.f32 %v420_v23, %v1523_v3  ;;  %955 = vmatprep.mubr.msk.f32.mxu1 %vm473_vm1, %v446_v19  ;;  %v668_v23 = vsub.s32 4, %v1438_v7 }
 0x1c2   :  { %633 = vmatmul.mubr.f32.gmra.mrb[22].mxu1 %v445_v21  ;;  %v447_v26 = vmax.f32 %v419_v22, 0.0  ;;  %v1574_v3 = vrot.slane %v1441_v9, %v471_v2 }
 0x1c3   :  { %v448_v25 = vmax.f32 %v421_v24, 0.0  ;;  %v1626_v24 = vrot.slane %v1441_v9, %v668_v23 }
 0x1c5   :  { %956 = vmatprep.mubr.msk.f32.mxu1 %vm473_vm1, %v448_v25  ;;  %v854_v25 = vsub.s32 5, %v1438_v7 }
 0x1c6   :  { %638 = vmatmul.mubr.f32.gmra.mrb[24].mxu1 %v447_v26 }
 0x1c7   :  { %1040 = vmatprep.mubr.msk.f32.mxu1 %vm1218_vm2, %v1216_v44  ;;  %v1631_v29 = vrot.slane %v1441_v9, %v854_v25 }
 0x269   :  { %v579_v11 = vpop.f32.mrb[0].mxu1 }
 0x26a   :  { %v580_v30 = vadd.f32 %v579_v11, %v1574_v3  ;;  %v581_v31 = vpop.f32.mrb[1].mxu1 }
 0x26c   :  { %v643_v32 = vmax.f32 %v580_v30, 0.0 }
 0x26d   :  { %v584_v12 = vpop.f32.mrb[2].mxu1 }
 0x26e   :  { %v585_v33 = vadd.f32 %v584_v12, %v1574_v3  ;;  %v586_v34 = vpop.f32.mrb[3].mxu1  ;;  %1014 = vmatmul.mubr.msk.f32.vlgmr.msra.gmra.mrb[26].mxu0 %vm240_vm0, %v643_v32 }
 0x26f   :  { %1016 = vmatprep.mubr.msk.f32.mxu0 %vm1218_vm2, %v1216_v44 }
 0x270   :  { %v644_v35 = vmax.f32 %v585_v33, 0.0 }
 0x271   :  { %v589_v36 = vpop.f32.mrb[4].mxu1 }
 0x272   :  { %v590_v37 = vadd.f32 %v589_v36, %v1574_v3  ;;  %v591_v38 = vpop.f32.mrb[5].mxu1  ;;  %1017 = vmatmul.mubr.msk.f32.gmra.mrb[28].mxu0 %vm240_vm0, %v644_v35 }
 0x273   :  { %1019 = vmatprep.mubr.msk.f32.mxu0 %vm1218_vm2, %v1216_v44 }
 0x274   :  { %v645_v39 = vmax.f32 %v590_v37, 0.0 }
 0x275   :  { %v594_v40 = vpop.f32.mrb[6].mxu1 }
 0x276   :  { %v595_v41 = vadd.f32 %v594_v40, %v1574_v3  ;;  %v596_v42 = vpop.f32.mrb[7].mxu1  ;;  %1020 = vmatmul.mubr.msk.f32.gmra.mrb[30].mxu0 %vm240_vm0, %v645_v39 }
 0x277   :  { %1022 = vmatprep.mubr.msk.f32.mxu0 %vm1218_vm2, %v1216_v44 }
 0x278   :  { %v646_v43 = vmax.f32 %v595_v41, 0.0 }
 0x279   :  { %v599_v45 = vpop.f32.mrb[8].mxu1 }
 0x27a   :  { %v600_v46 = vadd.f32 %v599_v45, %v1574_v3  ;;  %v601_v47 = vpop.f32.mrb[9].mxu1  ;;  %1023 = vmatmul.mubr.msk.f32.gmra.mrb[32].mxu0 %vm240_vm0, %v646_v43 }
 0x27b   :  { %1025 = vmatprep.mubr.msk.f32.mxu0 %vm1218_vm2, %v1216_v44 }
 0x27c   :  { %v647_v49 = vmax.f32 %v600_v46, 0.0 }
 0x27d   :  { %v604_v50 = vpop.f32.mrb[10].mxu1 }
 0x27e   :  { %v605_v48 = vadd.f32 %v604_v50, %v1574_v3  ;;  %v606_v51 = vpop.f32.mrb[11].mxu1  ;;  %1026 = vmatmul.mubr.msk.f32.gmra.mrb[34].mxu0 %vm240_vm0, %v647_v49 }
 0x27f   :  { %1028 = vmatprep.mubr.msk.f32.mxu0 %vm1218_vm2, %v1216_v44 }
 0x280   :  { %v648_v52 = vmax.f32 %v605_v48, 0.0 }
 0x281   :  { %v609_v53 = vpop.f32.mrb[12].mxu1 }
 0x282   :  { %v610_v54 = vadd.f32 %v609_v53, %v1574_v3  ;;  %v611_v55 = vpop.f32.mrb[13].mxu1  ;;  %1029 = vmatmul.mubr.msk.f32.gmra.mrb[36].mxu0 %vm240_vm0, %v648_v52 }
 0x283   :  { %1031 = vmatprep.mubr.msk.f32.mxu0 %vm1218_vm2, %v1216_v44 }
 0x284   :  { %v649_v56 = vmax.f32 %v610_v54, 0.0 }
 0x285   :  { %v614_v57 = vpop.f32.mrb[14].mxu1 }
 0x286   :  { %v615_v58 = vadd.f32 %v614_v57, %v1574_v3  ;;  %v616_v59 = vpop.f32.mrb[15].mxu1  ;;  %1032 = vmatmul.mubr.msk.f32.gmra.mrb[38].mxu0 %vm240_vm0, %v649_v56 }
 0x287   :  { %1034 = vmatprep.mubr.msk.f32.mxu0 %vm1218_vm2, %v1216_v44 }
 0x288   :  { %v650_v60 = vmax.f32 %v615_v58, 0.0 }
 0x289   :  { %v619_v61 = vpop.f32.mrb[16].mxu1 }
 0x28a   :  { %v620_v62 = vadd.f32 %v619_v61, %v1574_v3  ;;  %v621_v63 = vpop.f32.mrb[17].mxu1  ;;  %1035 = vmatmul.mubr.msk.f32.gmra.mrb[40].mxu0 %vm240_vm0, %v650_v60 }
 0x28b   :  { %1037 = vmatprep.mubr.msk.f32.mxu0 %vm1218_vm2, %v1216_v44 }
 0x28c   :  { %v651_v0 = vmax.f32 %v620_v62, 0.0 }
 0x28d   :  { %v624_v1 = vpop.f32.mrb[18].mxu1 }
 0x28e   :  { %v625_v4 = vadd.f32 %v624_v1, %v1574_v3  ;;  %v626_v5 = vpop.f32.mrb[19].mxu1  ;;  %1038 = vmatmul.mubr.msk.f32.gmra.mrb[42].mxu0 %vm240_vm0, %v651_v0 }
 0x290   :  { %v652_v6 = vmax.f32 %v625_v4, 0.0 }
 0x291   :  { %v629_v8 = vpop.f32.mrb[20].mxu1 }
 0x292   :  { %v630_v10 = vadd.f32 %v629_v8, %v1574_v3  ;;  %v631_v13 = vpop.f32.mrb[21].mxu1  ;;  %1041 = vmatmul.mubr.msk.f32.vlgmr.msra.gmra.mrb[26].mxu1 %vm240_vm0, %v652_v6 }
 0x293   :  { %1043 = vmatprep.mubr.msk.f32.mxu1 %vm1218_vm2, %v1216_v44 }
 0x294   :  { %v653_v14 = vmax.f32 %v630_v10, 0.0 }
 0x295   :  { %v634_v15 = vpop.f32.mrb[22].mxu1 }
 0x296   :  { %v635_v16 = vadd.f32 %v634_v15, %v1574_v3  ;;  %v636_v17 = vpop.f32.mrb[23].mxu1  ;;  %1044 = vmatmul.mubr.msk.f32.gmra.mrb[28].mxu1 %vm240_vm0, %v653_v14 }
 0x297   :  { %1046 = vmatprep.mubr.msk.f32.mxu1 %vm1218_vm2, %v1216_v44 }
 0x298   :  { %v654_v18 = vmax.f32 %v635_v16, 0.0 }
 0x299   :  { %v639_v19 = vpop.f32.mrb[24].mxu1 }
 0x29a   :  { %v640_v20 = vadd.f32 %v639_v19, %v1574_v3  ;;  %v641_v21 = vpop.f32.mrb[25].mxu1  ;;  %1047 = vmatmul.mubr.msk.f32.gmra.mrb[30].mxu1 %vm240_vm0, %v654_v18 }
 0x29b   :  { %1049 = vmatprep.mubr.msk.f32.mxu1 %vm1218_vm2, %v1216_v44 }
 0x29c   :  { %v655_v22 = vmax.f32 %v640_v20, 0.0 }
 0x29e   :  { %1050 = vmatmul.mubr.msk.f32.gmra.mrb[32].mxu1 %vm240_vm0, %v655_v22 }
 0x341   :  { %v775_v26 = vpop.f32.mrb[26].mxu0 }
 0x342   :  { %v776_v27 = vadd.f32 %v775_v26, %v1626_v24  ;;  %v1015_v28 = vpop.f32.mrb[27].mxu0 }
 0x344   :  { %v839_v2 = vmax.f32 %v776_v27, 0.0 }
 0x345   :  { %v780_v3 = vpop.f32.mrb[28].mxu0 }
 0x346   :  { %v781_v44 = vadd.f32 %v780_v3, %v1626_v24  ;;  %v1018_v11 = vpop.f32.mrb[29].mxu0  ;;  %v856_v30 = vmul.f32 %v1631_v29, %v839_v2 }
 0x348   :  { %v840_v31 = vmax.f32 %v781_v44, 0.0  ;;  %869 = vadd.xlane.f32.xlu1 %v856_v30  ;;  %v897_v44 = vsub.s32 6, %v1438_v7 }
 0x349   :  { %v785_v32 = vpop.f32.mrb[30].mxu0 }
 0x34a   :  { %v786_v12 = vadd.f32 %v785_v32, %v1626_v24  ;;  %v1021_v33 = vpop.f32.mrb[31].mxu0  ;;  %v857_v34 = vmul.f32 %v1631_v29, %v840_v31  ;;  %v898_v11 = vrot.slane %v1441_v9, %v897_v44 }
 0x34c   :  { %v841_v35 = vmax.f32 %v786_v12, 0.0  ;;  %871 = vadd.xlane.f32.xlu0 %v857_v34 }
 0x34d   :  { %v790_v36 = vpop.f32.mrb[32].mxu0 }
 0x34e   :  { %v791_v37 = vadd.f32 %v790_v36, %v1626_v24  ;;  %v1024_v38 = vpop.f32.mrb[33].mxu0  ;;  %v858_v39 = vmul.f32 %v1631_v29, %v841_v35 }
 0x350   :  { %v842_v40 = vmax.f32 %v791_v37, 0.0  ;;  %873 = vadd.xlane.f32.xlu0 %v858_v39 }
 0x351   :  { %v795_v41 = vpop.f32.mrb[34].mxu0 }
 0x352   :  { %v796_v42 = vadd.f32 %v795_v41, %v1626_v24  ;;  %v1027_v43 = vpop.f32.mrb[35].mxu0  ;;  %v859_v45 = vmul.f32 %v1631_v29, %v842_v40 }
 0x354   :  { %v843_v46 = vmax.f32 %v796_v42, 0.0  ;;  %875 = vadd.xlane.f32.xlu1 %v859_v45 }
 0x355   :  { %v800_v47 = vpop.f32.mrb[36].mxu0 }
 0x356   :  { %v801_v49 = vadd.f32 %v800_v47, %v1626_v24  ;;  %v1030_v50 = vpop.f32.mrb[37].mxu0  ;;  %v860_v48 = vmul.f32 %v1631_v29, %v843_v46 }
 0x358   :  { %v844_v51 = vmax.f32 %v801_v49, 0.0  ;;  %877 = vadd.xlane.f32.xlu0 %v860_v48 }
 0x359   :  { %v805_v52 = vpop.f32.mrb[38].mxu0 }
 0x35a   :  { %v806_v53 = vadd.f32 %v805_v52, %v1626_v24  ;;  %v1033_v54 = vpop.f32.mrb[39].mxu0  ;;  %v861_v55 = vmul.f32 %v1631_v29, %v844_v51 }
 0x35c   :  { %v845_v56 = vmax.f32 %v806_v53, 0.0  ;;  %879 = vadd.xlane.f32.xlu1 %v861_v55 }
 0x35d   :  { %v810_v57 = vpop.f32.mrb[40].mxu0 }
 0x35e   :  { %v811_v58 = vadd.f32 %v810_v57, %v1626_v24  ;;  %v1036_v59 = vpop.f32.mrb[41].mxu0  ;;  %v862_v60 = vmul.f32 %v1631_v29, %v845_v56 }
 0x360   :  { %v846_v61 = vmax.f32 %v811_v58, 0.0  ;;  %881 = vadd.xlane.f32.xlu0 %v862_v60 }
 0x361   :  { %v815_v62 = vpop.f32.mrb[42].mxu0 }
 0x362   :  { %v816_v63 = vadd.f32 %v815_v62, %v1626_v24  ;;  %v1039_v0 = vpop.f32.mrb[43].mxu0  ;;  %v863_v1 = vmul.f32 %v1631_v29, %v846_v61 }
 0x364   :  { %v847_v4 = vmax.f32 %v816_v63, 0.0  ;;  %883 = vadd.xlane.f32.xlu1 %v863_v1 }
 0x365   :  { %v820_v5 = vpop.f32.mrb[26].mxu1 }
 0x366   :  { %v821_v6 = vadd.f32 %v820_v5, %v1626_v24  ;;  %v1042_v8 = vpop.f32.mrb[27].mxu1  ;;  %v864_v10 = vmul.f32 %v1631_v29, %v847_v4 }
 0x368   :  { %v848_v13 = vmax.f32 %v821_v6, 0.0  ;;  %885 = vadd.xlane.f32.xlu0 %v864_v10 }
 0x369   :  { %v825_v14 = vpop.f32.mrb[28].mxu1 }
 0x36a   :  { %v826_v15 = vadd.f32 %v825_v14, %v1626_v24  ;;  %v1045_v16 = vpop.f32.mrb[29].mxu1  ;;  %v865_v17 = vmul.f32 %v1631_v29, %v848_v13 }
 0x36c   :  { %v849_v18 = vmax.f32 %v826_v15, 0.0  ;;  %887 = vadd.xlane.f32.xlu1 %v865_v17 }
 0x36d   :  { %v830_v19 = vpop.f32.mrb[30].mxu1 }
 0x36e   :  { %v831_v20 = vadd.f32 %v830_v19, %v1626_v24  ;;  %v1048_v21 = vpop.f32.mrb[31].mxu1  ;;  %v866_v22 = vmul.f32 %v1631_v29, %v849_v18 }
 0x370   :  { %v850_v23 = vmax.f32 %v831_v20, 0.0  ;;  %889 = vadd.xlane.f32.xlu0 %v866_v22 }
 0x371   :  { %v835_v25 = vpop.f32.mrb[32].mxu1 }
 0x372   :  { %v836_v26 = vadd.f32 %v835_v25, %v1626_v24  ;;  %v1051_v27 = vpop.f32.mrb[33].mxu1  ;;  %v867_v28 = vmul.f32 %v1631_v29, %v850_v23 }
 0x374   :  { %v851_v2 = vmax.f32 %v836_v26, 0.0  ;;  %891 = vadd.xlane.f32.xlu1 %v867_v28 }
 0x376   :  { %v868_v3 = vmul.f32 %v1631_v29, %v851_v2 }
 0x378   :  { %893 = vadd.xlane.f32.xlu0 %v868_v3 }
 0x3d5   :  { %v870_v30 = vpop.xlane.xlu1 %869 }
 0x3d6   :  { %v899_v31 = vadd.f32 %v898_v11, %v870_v30 }
 0x3d8   :  { %912 = vst [vmem:[%s1704_s5] sm:$0xff] %v899_v31 }
 0x3d9   :  { %v872_v32 = vpop.xlane.xlu0 %871 }
 0x3da   :  { %v900_v24 = vadd.f32 %v898_v11, %v872_v32 }
 0x3dc   :  { %913 = vst [vmem:[%s1704_s5 + $0x8] sm:$0xff] %v900_v24 }
 0x3dd   :  { %v874_v12 = vpop.xlane.xlu0 %873 }
 0x3de   :  { %v901_v33 = vadd.f32 %v898_v11, %v874_v12 }
 0x3e0   :  { %914 = vst [vmem:[%s1704_s5 + $0x10] sm:$0xff] %v901_v33 }
 0x3e1   :  { %v876_v7 = vpop.xlane.xlu1 %875 }
 0x3e2   :  { %v902_v9 = vadd.f32 %v898_v11, %v876_v7 }
 0x3e4   :  { %915 = vst [vmem:[%s1704_s5 + $0x18] sm:$0xff] %v902_v9 }
 0x3e5   :  { %v878_v29 = vpop.xlane.xlu0 %877 }
 0x3e6   :  { %v903_v34 = vadd.f32 %v898_v11, %v878_v29 }
 0x3e8   :  { %916 = vst [vmem:[%s1704_s5 + $0x20] sm:$0xff] %v903_v34 }
 0x3e9   :  { %v880_v35 = vpop.xlane.xlu1 %879 }
 0x3ea   :  { %v904_v36 = vadd.f32 %v898_v11, %v880_v35 }
 0x3ec   :  { %917 = vst [vmem:[%s1704_s5 + $0x28] sm:$0xff] %v904_v36 }
 0x3ed   :  { %v882_v37 = vpop.xlane.xlu0 %881 }
 0x3ee   :  { %v905_v38 = vadd.f32 %v898_v11, %v882_v37 }
 0x3f0   :  { %918 = vst [vmem:[%s1704_s5 + $0x30] sm:$0xff] %v905_v38 }
 0x3f1   :  { %v884_v39 = vpop.xlane.xlu1 %883 }
 0x3f2   :  { %v906_v40 = vadd.f32 %v898_v11, %v884_v39 }
 0x3f4   :  { %919 = vst [vmem:[%s1704_s5 + $0x38] sm:$0xff] %v906_v40 }
 0x3f5   :  { %v886_v41 = vpop.xlane.xlu0 %885 }
 0x3f6   :  { %v907_v42 = vadd.f32 %v898_v11, %v886_v41 }
 0x3f8   :  { %920 = vst [vmem:[%s1704_s5 + $0x40] sm:$0xff] %v907_v42 }
 0x3f9   :  { %v888_v43 = vpop.xlane.xlu1 %887 }
 0x3fa   :  { %v908_v45 = vadd.f32 %v898_v11, %v888_v43 }
 0x3fc   :  { %921 = vst [vmem:[%s1704_s5 + $0x48] sm:$0xff] %v908_v45 }
 0x3fd   :  { %v890_v46 = vpop.xlane.xlu0 %889 }
 0x3fe   :  { %v909_v47 = vadd.f32 %v898_v11, %v890_v46 }
 0x400   :  { %922 = vst [vmem:[%s1704_s5 + $0x50] sm:$0xff] %v909_v47 }
 0x401   :  { %v892_v49 = vpop.xlane.xlu1 %891 }
 0x402   :  { %v910_v50 = vadd.f32 %v898_v11, %v892_v49 }
 0x404   :  { %923 = vst [vmem:[%s1704_s5 + $0x58] sm:$0xff] %v910_v50 }
 0x405   :  { %v894_v48 = vpop.xlane.xlu0 %893 }
 0x406   :  { %v911_v51 = vadd.f32 %v898_v11, %v894_v48 }
 0x408   :  { %924 = vst [vmem:[%s1704_s5 + $0x60] sm:$0xff] %v911_v51 }
 0x409   :  { %929 = vsyncpa [#allocation3], 1 }
 0x40a   :  { %930 = vsyncpa [#allocation5], 1 }

</bundles_post_ra>
